<compile_context>
chip_gen: v5e
topology: v5e:2x2
jax: 0.10.0
libtpu: 0.0.40
codegen_flags: <defaults>
</compile_context>

<pallas_src>
import jax
import jax.numpy as jnp
from jax.experimental import pallas as pl
from jax.experimental.pallas import tpu as pltpu

LN_EPS = 1e-5  # torch.nn.LayerNorm default


def normfc_kernel(x_ref, w_ref, bias_ref, o_ref):
    # x: (tm, F)    w: (F, E)  [gamma already folded in]    bias: (1, E) f32
    x = x_ref[...].astype(jnp.float32)

    # LayerNorm statistics over the feature (last) dim, biased variance (torch).
    mean = jnp.mean(x, axis=-1, keepdims=True)
    xc = x - mean
    var = jnp.mean(xc * xc, axis=-1, keepdims=True)
    xn = xc * jax.lax.rsqrt(var + LN_EPS)

    # Linear with the LN affine folded into (w, bias); f32 accumulation on MXU.
    y = jnp.dot(xn.astype(w_ref.dtype), w_ref[...],
                preferred_element_type=jnp.float32)
    o_ref[...] = (y + bias_ref[...]).astype(o_ref.dtype)


def _round_up(x, m):
    return ((x + m - 1) // m) * m


def _pick_tile_and_vmem(rows, feat, emb, x_itemsize, w_itemsize, out_itemsize,
                        tm_target, vmem_budget_bytes):
    """Pick the row tile under a VMEM budget and a matching scoped-VMEM limit."""
    # Grid-invariant operands (double-buffered by the default pipeline).
    fixed = 2 * feat * emb * w_itemsize            # folded weight
    fixed += 2 * emb * 4                           # folded bias (f32)

    # Per-row cost: double-buffered x tile + double-buffered out tile
    # + in-kernel f32 temporaries (x/xn: feat wide, y: emb wide).
    per_row = 2 * feat * x_itemsize + 2 * emb * out_itemsize
    per_row += (2 * feat + emb) * 4

    tm = max(8, _round_up(tm_target, 8))
    while tm > 8 and fixed + tm * per_row > vmem_budget_bytes:
        tm //= 2

    if rows >= 16:
        # Keep >= 2 grid steps so the "parallel" axis can span both v7x TCs.
        tm = min(tm, _round_up(pl.cdiv(rows, 2), 8))
    else:
        tm = min(tm, _round_up(rows, 8))
    tm = max(8, (tm // 8) * 8)

    needed = fixed + tm * per_row
    try:
        phys = pltpu.get_tpu_info().vmem_capacity_bytes
    except Exception:
        phys = 64 << 20  # conservative (v7x per-TC)
    vmem_limit = min(max(32 << 20, 2 * needed + (8 << 20)), (phys * 3) // 4)
    return tm, vmem_limit


def normfc_prepare_params(gamma, beta, w, bias, *, mxu_dtype=None):
    """Fold the LayerNorm affine into the Linear.  Call ONCE at init time.

    gamma, beta: (F,)   w: (F, E) (torch weight.T)   bias: (E,)
    Returns (w_fold, bias_fold) with w_fold: (F, E), bias_fold: (1, E) f32.
    """
    w_f32 = w.astype(jnp.float32)
    w_fold = gamma.astype(jnp.float32)[:, None] * w_f32          # fold in f32
    bias_fold = beta.astype(jnp.float32) @ w_f32 + bias.astype(jnp.float32)
    w_dtype = jnp.dtype(mxu_dtype) if mxu_dtype is not None else jnp.dtype(jnp.float32)
    return w_fold.astype(w_dtype), bias_fold.reshape(1, -1)


def normfc_forward(xb, w_fold, bias_fold, *, tm=4096, vmem_budget_bytes=32 << 20):
    """Fused LayerNorm(F) + Linear(F -> E) with pre-folded params.

    xb: (B, T, F)   w_fold: (F, E)   bias_fold: (1, E) f32
    Returns (B, T, E) in xb.dtype.
    """
    B, T, F = xb.shape
    E = w_fold.shape[1]
    R = B * T
    x2d = xb.reshape(R, F)

    x_itemsize = jnp.dtype(xb.dtype).itemsize
    tm, vmem_limit = _pick_tile_and_vmem(
        R, F, E, x_itemsize, jnp.dtype(w_fold.dtype).itemsize, x_itemsize,
        tm, vmem_budget_bytes)

    grid = (pl.cdiv(R, tm),)  # ragged last tile: OOB rows' writes are masked

    out = pl.pallas_call(
        normfc_kernel,
        out_shape=jax.ShapeDtypeStruct((R, E), xb.dtype),
        grid_spec=pltpu.PrefetchScalarGridSpec(
            num_scalar_prefetch=0,
            grid=grid,
            in_specs=[
                pl.BlockSpec((tm, F), lambda i: (i, 0)),   # x rows
                pl.BlockSpec((F, E), lambda i: (0, 0)),    # folded weight
                pl.BlockSpec((1, E), lambda i: (0, 0)),    # folded bias
            ],
            out_specs=pl.BlockSpec((tm, E), lambda i: (i, 0)),
        ),
        compiler_params=pltpu.CompilerParams(
            dimension_semantics=("parallel",),
            vmem_limit_bytes=vmem_limit,
        ),
    )(x2d, w_fold, bias_fold)

    return out.reshape(B, T, E)


def normfc_apply(xb, gamma, beta, w, bias, **kwargs):
    """Convenience wrapper: fold params then run (prefer folding once at init)."""
    mxu_dtype = kwargs.pop("mxu_dtype", None)
    w_fold, bias_fold = normfc_prepare_params(gamma, beta, w, bias, mxu_dtype=mxu_dtype)
    return normfc_forward(xb, w_fold, bias_fold, **kwargs)


def reference_forward(xb, gamma, beta, w, bias):
    mean = jnp.mean(xb, axis=-1, keepdims=True)
    var = jnp.mean((xb - mean) ** 2, axis=-1, keepdims=True)
    xn = (xb - mean) / jnp.sqrt(var + LN_EPS) * gamma + beta
    return xn @ w + bias


if __name__ == "__main__":
    # NormFC hyperparameters (treat_channel_as_feature=True path):
    #   fc_in = in_channels * bandwidth * 2, LayerNorm(fc_in), Linear(fc_in -> emb_dim)
    batch = 2
    n_time = 12
    in_channels = 2
    bandwidth = 8
    reim = 2
    emb_dim = 32
    fc_in = in_channels * bandwidth * reim  # 32

    key = jax.random.PRNGKey(0)
    kx, kw, kb, kg, kbt = jax.random.split(key, 5)

    # Input xb: (batch, n_time, in_channels * bandwidth * 2)
    xb = jax.random.normal(kx, (batch, n_time, fc_in), dtype=jnp.float32)

    # Non-trivial LayerNorm affine (exercises the wrapper-side fold) and
    # torch-default-style Linear init.
    gamma = 1.0 + 0.1 * jax.random.normal(kg, (fc_in,), jnp.float32)
    beta = 0.1 * jax.random.normal(kbt, (fc_in,), jnp.float32)
    lim = 1.0 / (fc_in ** 0.5)
    w = jax.random.uniform(kw, (fc_in, emb_dim), jnp.float32, -lim, lim)  # torch weight.T
    bias = jax.random.uniform(kb, (emb_dim,), jnp.float32, -lim, lim)

    ref = reference_forward(xb, gamma, beta, w, bias)

    # Fold the LN affine into the Linear once (module-init-time work).
    w_fold, bias_fold = normfc_prepare_params(gamma, beta, w, bias)

    # 1) Default path: auto row tile, f32 MXU operands.
    out = jax.block_until_ready(normfc_forward(xb, w_fold, bias_fold))
    assert out.shape == (batch, n_time, emb_dim)
    assert jnp.allclose(out, ref, atol=1e-4, rtol=1e-4)

    # 2) Forced small tile -> multi-step grid with a ragged (masked) last tile
    #    (R=24, tm=16 -> grid of 2, second tile only 8 valid rows).
    out_tiled = jax.block_until_ready(normfc_forward(xb, w_fold, bias_fold, tm=16))
    assert jnp.allclose(out_tiled, ref, atol=1e-4, rtol=1e-4)

    # 3) bf16 MXU operand path (f32 accumulation) -> looser tolerance.
    out_bf16 = jax.block_until_ready(
        normfc_apply(xb, gamma, beta, w, bias, mxu_dtype=jnp.bfloat16))
    assert jnp.allclose(out_bf16, ref, atol=5e-2, rtol=5e-2)

    print("KERNEL_OK")
</pallas_src>

<mosaic_0001>
module attributes {stable_mosaic.version = 11 : i64} {
  func.func @normfc_kernel(%arg0: i32, %arg1: memref<16x32xf32, #tpu.memory_space<vmem>>, %arg2: memref<32x32xf32, #tpu.memory_space<vmem>>, %arg3: memref<1x32xf32, #tpu.memory_space<vmem>>, %arg4: memref<16x32xf32, #tpu.memory_space<vmem>>) attributes {dimension_semantics = [#tpu.dimension_semantics<parallel>], iteration_bounds = array<i64: 2>, scalar_prefetch = 0 : i64, scratch_operands = 0 : i64, tpu.core_type = #tpu.core_type<tc>, window_params = [{transform_indices = @transform_0, window_bounds = array<i64: 16, 32>}, {pipeline_mode = #tpu.pipeline_mode<synchronous>, transform_indices = @transform_1, window_bounds = array<i64: 32, 32>}, {pipeline_mode = #tpu.pipeline_mode<synchronous>, transform_indices = @transform_2, window_bounds = array<i64: 1, 32>}, {transform_indices = @transform_3, window_bounds = array<i64: 16, 32>}]} {
    %c0 = arith.constant 0 : index
    %c0_0 = arith.constant 0 : index
    %0 = vector.load %arg1[%c0, %c0_0] : memref<16x32xf32, #tpu.memory_space<vmem>>, vector<16x32xf32>
    %cst = arith.constant dense<0.000000e+00> : vector<16xf32>
    %1 = vector.multi_reduction <add>, %0, %cst [1] : vector<16x32xf32> to vector<16xf32>
    %2 = vector.shape_cast %1 : vector<16xf32> to vector<16x1xf32>
    %cst_1 = arith.constant 3.200000e+01 : f32
    %3 = vector.broadcast %cst_1 : f32 to vector<16x1xf32>
    %4 = arith.divf %2, %3 : vector<16x1xf32>
    %5 = vector.broadcast %4 : vector<16x1xf32> to vector<16x32xf32>
    %6 = arith.subf %0, %5 : vector<16x32xf32>
    %7 = arith.mulf %6, %6 : vector<16x32xf32>
    %cst_2 = arith.constant dense<0.000000e+00> : vector<16xf32>
    %8 = vector.multi_reduction <add>, %7, %cst_2 [1] : vector<16x32xf32> to vector<16xf32>
    %9 = vector.shape_cast %8 : vector<16xf32> to vector<16x1xf32>
    %cst_3 = arith.constant 3.200000e+01 : f32
    %10 = vector.broadcast %cst_3 : f32 to vector<16x1xf32>
    %11 = arith.divf %9, %10 : vector<16x1xf32>
    %cst_4 = arith.constant 9.99999974E-6 : f32
    %12 = vector.broadcast %cst_4 : f32 to vector<16x1xf32>
    %13 = arith.addf %11, %12 : vector<16x1xf32>
    %14 = math.rsqrt %13 : vector<16x1xf32>
    %15 = vector.broadcast %14 : vector<16x1xf32> to vector<16x32xf32>
    %16 = arith.mulf %6, %15 : vector<16x32xf32>
    %c0_5 = arith.constant 0 : index
    %c0_6 = arith.constant 0 : index
    %17 = vector.load %arg2[%c0_5, %c0_6] : memref<32x32xf32, #tpu.memory_space<vmem>>, vector<32x32xf32>
    %cst_7 = arith.constant dense<0.000000e+00> : vector<16x32xf32>
    %18 = tpu.matmul %16, %17, %cst_7 {dimension_numbers = #tpu.dot_dimension_numbers<[1], [0], [0], [1], [0, 0, 1, 1], [], []>} : vector<16x32xf32>, vector<32x32xf32>, vector<16x32xf32> -> vector<16x32xf32>
    %c0_8 = arith.constant 0 : index
    %c0_9 = arith.constant 0 : index
    %19 = vector.load %arg3[%c0_8, %c0_9] : memref<1x32xf32, #tpu.memory_space<vmem>>, vector<1x32xf32>
    %20 = vector.broadcast %19 : vector<1x32xf32> to vector<16x32xf32>
    %21 = arith.addf %18, %20 : vector<16x32xf32>
    %c0_10 = arith.constant 0 : index
    %c0_11 = arith.constant 0 : index
    %22 = vector.load %arg4[%c0_10, %c0_11] : memref<16x32xf32, #tpu.memory_space<vmem>>, vector<16x32xf32>
    tpu.vector_store %arg4[%c0_10, %c0_11], %21 {strides = array<i32>} : memref<16x32xf32, #tpu.memory_space<vmem>>, vector<16x32xf32>,
    return
  }
  func.func @transform_0(%arg0: i32) -> (i32, i32) {
    %c0_i32 = arith.constant 0 : i32
    %c0_i32_0 = arith.constant 0 : i32
    return %arg0, %c0_i32 : i32, i32
  }
  func.func @transform_1(%arg0: i32) -> (i32, i32) {
    %c0_i32 = arith.constant 0 : i32
    %c0_i32_0 = arith.constant 0 : i32
    %c0_i32_1 = arith.constant 0 : i32
    return %c0_i32, %c0_i32_0 : i32, i32
  }
  func.func @transform_2(%arg0: i32) -> (i32, i32) {
    %c0_i32 = arith.constant 0 : i32
    %c0_i32_0 = arith.constant 0 : i32
    %c0_i32_1 = arith.constant 0 : i32
    return %c0_i32, %c0_i32_0 : i32, i32
  }
  func.func @transform_3(%arg0: i32) -> (i32, i32) {
    %c0_i32 = arith.constant 0 : i32
    %c0_i32_0 = arith.constant 0 : i32
    return %arg0, %c0_i32 : i32, i32
  }
}

</mosaic_0001>

<bundles_post_ra>
// kernel: tpu_custom_call.1
= control target key start
LH: loop header
LB: loop body
LE: loop exit
PB: predicated region body
PF: predicated region fallthrough
CT: control target
= control target key end

     0   :  { %8 = vsyncpa [#allocation3], 0  ;;  %s915_s0 = inlined_call_operand.hbm [shape: f32[24,32], index: 0, kind: input, shape index: {}]   ;;  %s916_s1 = inlined_call_operand.hbm [shape: f32[32,32], index: 1, kind: input, shape index: {}]   ;;  %s917_s2 = inlined_call_operand.vmem [shape: f32[1,32], index: 2, kind: input, shape index: {}]   ;;  %s918_s3 = inlined_call_operand.hbm [shape: f32[24,32], index: 3, kind: output, shape index: {}]  }
   0x1   :  { %10 = vsyncpa [#allocation3 + $0x1], 0 }
   0x2   :  { %11 = vsyncpa [#allocation6], 0 }
   0x3   :  { %12 = vsyncpa [#allocation4], 0 }
   0x4   :  { %14 = vsyncpa [#allocation4 + $0x1], 0  ;;  %s702_s12 = smov 0   ;;  %s704_s13 = smov 0  }
   0x5   :  { %s706_s14 = smov 0   ;;  %s708_s15 = smov 0  }
   0x6 LB: > { %s723_s16 = sadd.s32 4294967295, %s670_s15   ;;  %s424_s17 = sadd.s32 4294967294, %s670_s15   ;;  %s670_s15 = sphi %s708_s15, %s935_s15   ;;  %s666_s14 = sphi %s706_s14, %s934_s14   ;;  %s662_s13 = sphi %s704_s13, %s933_s13   ;;  %s658_s12 = sphi %s702_s12, %s932_s12  }
   0x7   : > { %s727_s18 = sadd.s32 1, %s670_s15   ;;  %s27_s19 = sadd.s32 1, %s666_s14 }
   0x8   : > { %s24_s20 = ssub.s32 %s670_s15, %s727_s18  ;;  %p34_p0 = scmp.ne.s32.totalorder %s666_s14, %s662_s13 }
   0x9   : > { %p25_p1 = scmp.eq.s32.totalorder %s24_s20, 0  ;;  %p35_p2 = scmp.eq.s32.totalorder %s670_s15, 0 }
   0xa   : > { %p40_p3 = scmp.ne.s32.totalorder %s662_s13, %s658_s12  ;;  %p920_p4 = scmp.eq.s32.totalorder %s723_s16, 0 }
   0xb   : > { %s739_s21 = scalar_select %p25_p1, %s666_s14, %s27_s19  }
   0xc   : > { %p741_p5 = por %p35_p2, %p34_p0  ;;  %p747_p6 = por %p920_p4, %p40_p3 }
   0xd   : > { %p106_p7 = scmp.eq.s32.totalorder %s723_s16, 1  ;;  %p112_p8 = scmp.eq.s32.totalorder %s424_s17, 1 }
   0xe   : > { %p425_p9 = scmp.ge.s32.totalorder %s670_s15, 1  ;;  %p119_p10 = scmp.lt.s32.totalorder %s670_s15, 3 }
   0xf   : > { %p754_p11 = por %p106_p7, %p34_p0  ;;  %p758_p12 = por %p112_p8, %p40_p3 }
  0x10   : > { %p762_p13 = pnand %p425_p9, %p119_p10  ;;  %s130_s29 = sshll.u32 %s916_s1, 4  ;;  %s131_s29 = int_to_ptr.hbm [resolvable:$true] %s130_s29 }
  0x11   : > { %s924_s25 = scalar_select %p758_p12, 1, 0 }
  0x12   : > { %p462_p1 = pneg %p762_p13  ;;  %s672_s30 = smov [#allocation5]  }
  0x13   : > { %s132_s4 = sshll.u32 %s672_s30, 4  ;;  %s673_s5 = smov 128   ;;  %s133_s4 = int_to_ptr.vmem [resolvable:$true] %s132_s4 }
  0x14   : > { %p463_p0 = pnand %p462_p1, %p920_p4  ;;  %s674_s6 = smov 8  }
  0x15   : > { %p919_p2 = scmp.ge.s32.totalorder %s670_s15, 2 }
  0x16   : > { %465 = dma.hbm_to_vmem [thread:$0]  (!%p463_p0), %s131_s29, 512, %s133_s4, [#allocation6], %s673_s5, %s673_s5, %s674_s6  }
  0x17   : > { %145 = sbr.rel (%p919_p2) target bundleno = 64 (0x40), region = 24 }
  0x1c   : > { %148 = sbr.rel (!%p741_p5) target bundleno = 64 (0x40), region = 28  ;;  %s149_s7 = sand.u32 (%p741_p5), 1, %s666_s14  }
  0x1d   : > { %s429_s8 = sshll.u32 (%p741_p5), %s670_s15, 1  ;;  %s428_s9 = sshll.u32 (%p741_p5), %s149_s7, 4 }
  0x1e   : > { %s155_s10 = ssub.s32 (%p741_p5), 3, %s429_s8  ;;  %s783_s20 = scalar_lea.sflag (%p741_p5), [#allocation3], %s149_s7 }
  0x1f   : > { %p156_p3 = scmp.lt.s32.totalorder (%p741_p5), %s155_s10, 2  ;;  %s153_s27 = scalar_lea.vmem (%p741_p5), [#allocation2], %s428_s9 }
  0x21   : > { %s937_s10 = smov (!%p156_p3, %s155_s10), 2 }
  0x22   : > { %s430_s11 = sshll.u32 %s937_s10, 3 }
  0x23   : > { %s159_s17 = ssub.s32 16, %s430_s11 }
  0x24   : > { %s160_s19 = sshll.u32 %s159_s17, 4 }
  0x25   : > { %161 = vsyncadd %s783_s20, %s160_s19  ;;  %p786_p5 = scmp.ne.s32.totalorder %s430_s11, 0  ;;  %s450_s28 = sshll.u32 %s670_s15, 4 }
  0x26   : > { %s164_s4 = scalar_lea.hbm %s915_s0, %s450_s28  ;;  %s794_s5 = sshll.u32 %s153_s27, 4  ;;  %s169_s5 = int_to_ptr.vmem [resolvable:$true] %s794_s5 }
  0x27   : > { %s166_s6 = sshll.u32 %s164_s4, 4  ;;  %s434_s7 = sshll.u32 %s937_s10, 7  ;;  %s797_s6 = int_to_ptr.hbm [resolvable:$true] %s166_s6 }
  0x28   : > { %s550_s8 = sshra.s32 %s797_s6, 4  ;;  %s552_s9 = sshrl.u32 %s434_s7, 4  ;;  %s551_s8 = int_to_ptr.hbm [resolvable:$true] %s550_s8 }
  0x29   : > { %s557_s11 = scalar_lea.hbm %s551_s8, %s552_s9  ;;  %s561_s27 = scalar_lea.hbm %s915_s0, 24 }
  0x2a   : > { %p558_p7 = scmp.ne.s32.totalorder %s551_s8, %s557_s11  ;;  %p562_p10 = scmp.lt.s32.totalorder %s551_s8, %s915_s0 }
  0x2b   : > { %p563_p1 = scmp.lt.s32.totalorder %s561_s27, %s557_s11 }
  0x2c   : > { %p559_p8 = pnand %p558_p7, %p786_p5 }
  0x2d   : > { %p564_p0 = por %p563_p1, %p562_p10 }
  0x2e   : > { %p560_p9 = pneg %p559_p8 }
  0x30   : > { %p565_p3 = pnand %p564_p0, %p560_p9 }
  0x32   : > { %568 = shalt.err (!%p565_p3)
}
  0x33   : > { %s569_s30 = sshra.s32 %s169_s5, 4  ;;  %s675_s17 = smov [#allocation2]   ;;  %s570_s30 = int_to_ptr.vmem [resolvable:$true] %s569_s30 }
  0x34   : > { %s576_s4 = scalar_lea.vmem %s570_s30, %s552_s9  ;;  %s580_s19 = scalar_lea.vmem %s675_s17, 32 }
  0x35   : > { %p577_p7 = scmp.ne.s32.totalorder %s570_s30, %s576_s4  ;;  %p582_p4 = scmp.lt.s32.totalorder %s580_s19, %s576_s4 }
  0x37   : > { %p578_p8 = pnand %p577_p7, %p786_p5 }
  0x39   : > { %p579_p2 = pneg %p578_p8 }
  0x3b   : > { %p584_p12 = pnand %p582_p4, %p579_p2 }
  0x3d   : > { %587 = shalt.err (!%p584_p12)
}
  0x3e   : > { %s676_s8 = smov 128   ;;  %s677_s11 = smov 8  }
  0x3f   : > { %174 = dma.hbm_to_vmem [thread:$0]  (%p786_p5), %s797_s6, %s434_s7, %s169_s5, %s783_s20, %s676_s8, %s676_s8, %s677_s11  }
  0x40 PF: > { %180 = sbr.rel (%p762_p13) target bundleno = 506 (0x1fa), region = 32  ;;  %s826_s9 = sand.u32 (!%p762_p13), 1, %s662_s13  }
  0x41   : > { %s436_s27 = sshll.u32 (!%p762_p13), %s826_s9, 4  ;;  %s183_s28 = scalar_lea.sflag (!%p762_p13), [#allocation3], %s826_s9 }
  0x42   : > { %s186_s29 = scalar_lea.vmem (!%p762_p13), [#allocation2], %s436_s27 }
  0x45   : > { %645 = dma.done.wait (%p747_p6), %s183_s28, 256  }
  0x46   : > { %647 = vsyncadd (%p747_p6), %s183_s28, 4294967040  ;;  %p927_p4 = scmp.eq.s32.totalorder %s723_s16, 0 }
  0x48   : > { %649 = dma.done.wait (%p927_p4), [#allocation6], 512   ;;  %p928_p12 = pmov %p927_p4 }
  0x49   : > { %vm227_vm0 = vcmask 261120   ;;  %v225_v0 = vld [vmem:[%s186_s29] sm:$0xff]  ;;  %v226_v2 = vld [vmem:[%s186_s29 + $0x8] sm:$0xff]  ;;  %v678_v4 = vmov 32.0   ;;  %s214_s10 = scalar_lea.vmem [#allocation7], %s436_s27  ;;  %s319_s20 = scalar_lea.sflag [#allocation4], %s826_s9 }
  0x4a   : > { %651 = vsyncadd (%p928_p12), [#allocation6], 4294966784  ;;  %v228_v1 = vsel %vm227_vm0, %v225_v0, 0.0  ;;  %v231_v3 = vsel %vm227_vm0, %v226_v2, 0.0  ;;  %514 = vrcp.f32 %v678_v4  ;;  %v282_v21 = vld [vmem:[#allocation5 + $0x18] sm:$0xff]  ;;  %v281_v22 = vld [vmem:[#allocation5 + $0x10] sm:$0xff] }
  0x4b   : > { %229 = vadd.xlane.f32.xlu0 %v228_v1  ;;  %305 = vmatpush.msra.mxu0 %v282_v21  ;;  %v280_v23 = vld [vmem:[#allocation5 + $0x8] sm:$0xff]  ;;  %v279_v24 = vld [vmem:[#allocation5] sm:$0xff]  ;;  %s442_s22 = sshll.u32 (%p754_p11), %s723_s16, 1 }
  0x4c   : > { %452 = vmatpush.msra.mxu1 %v282_v21  ;;  %v513_v47 = vld [vmem:[%s917_s2] ss:$0 sm:$0xff]  ;;  %s327_s5 = ssub.s32 (%p754_p11), 3, %s442_s22 }
  0x4d   : > { %306 = vmatpush.msra.mxu0 %v281_v22  ;;  %p328_p6 = scmp.lt.s32.totalorder (%p754_p11), %s327_s5, 2 }
  0x4e   : > { %453 = vmatpush.msra.mxu1 %v281_v22 }
  0x4f   : > { %307 = vmatpush.msra.mxu0 %v280_v23 }
  0x50   : > { %v515_v5 = vpop.eup %514  ;;  %454 = vmatpush.msra.mxu1 %v280_v23 }
  0x51   : > { %v235_v6 = vmul.f32 32.0, %v515_v5  ;;  %vm239_vm1 = vweird.f32 %v515_v5  ;;  %308 = vmatpush.msra.mxu0 %v279_v24 }
  0x52   : > { %455 = vmatpush.msra.mxu1 %v279_v24 }
  0x53   : > { %232 = vadd.xlane.f32.xlu0 %v231_v3  ;;  %v236_v7 = vsub.f32 1.0, %v235_v6 }
  0x55   : > { %v237_v8 = vmul.f32 %v515_v5, %v236_v7 }
  0x57   : > { %v238_v9 = vadd.f32 %v515_v5, %v237_v8 }
  0x59   : > { %v240_v10 = vsel %vm239_vm1, %v515_v5, %v238_v9 }
  0xbe   : > { %v230_v11 = vpop.xlane.xlu0 %229 }
  0xbf   : > { %v241_v12 = vmul.f32 %v240_v10, %v230_v11 }
  0xc1   : > { %v243_v13 = vsub.f32 %v225_v0, %v241_v12 }
  0xc3   : > { %v245_v14 = vmul.f32 %v243_v13, %v243_v13 }
  0xc5   : > { %v247_v15 = vsel %vm227_vm0, %v245_v14, 0.0 }
  0xc6   : > { %248 = vadd.xlane.f32.xlu1 %v247_v15  ;;  %v233_v16 = vpop.xlane.xlu0 %232 }
  0xc7   : > { %v242_v17 = vmul.f32 %v240_v10, %v233_v16 }
  0xc9   : > { %v244_v18 = vsub.f32 %v226_v2, %v242_v17 }
  0xcb   : > { %v246_v19 = vmul.f32 %v244_v18, %v244_v18 }
  0xcd   : > { %v250_v20 = vsel %vm227_vm0, %v246_v19, 0.0 }
  0xce   : > { %251 = vadd.xlane.f32.xlu1 %v250_v20 }
 0x139   : > { %v249_v25 = vpop.xlane.xlu1 %248 }
 0x13a   : > { %v253_v26 = vmul.f32 %v249_v25, %v240_v10 }
 0x13c   : > { %v255_v27 = vadd.f32 1e-05, %v253_v26 }
 0x13e   : > { %516 = vrsqrt.f32 %v255_v27  ;;  %vm263_vm3 = vweird.f32 %v255_v27 }
 0x141   : > { %v252_v28 = vpop.xlane.xlu1 %251 }
 0x142   : > { %v254_v29 = vmul.f32 %v252_v28, %v240_v10 }
 0x144   : > { %v517_v30 = vpop.eup %516  ;;  %v256_v31 = vadd.f32 1e-05, %v254_v29 }
 0x145   : > { %v258_v32 = vmul.f32 %v517_v30, %v255_v27  ;;  %vm264_vm2 = vweird.f32 %v517_v30 }
 0x146   : > { %518 = vrsqrt.f32 %v256_v31  ;;  %vm265_vm4 = vmor %vm263_vm3, %vm264_vm2  ;;  %vm273_vm6 = vweird.f32 %v256_v31 }
 0x147   : > { %v259_v33 = vmul.f32 %v517_v30, %v258_v32 }
 0x149   : > { %v260_v34 = vmul.f32 0.5, %v259_v33 }
 0x14b   : > { %v261_v35 = vsub.f32 1.5, %v260_v34 }
 0x14c   : > { %v519_v36 = vpop.eup %518 }
 0x14d   : > { %v268_v37 = vmul.f32 %v519_v36, %v256_v31  ;;  %v262_v38 = vmul.f32 %v517_v30, %v261_v35  ;;  %vm274_vm5 = vweird.f32 %v519_v36 }
 0x14e   : > { %vm275_vm7 = vmor %vm273_vm6, %vm274_vm5 }
 0x14f   : > { %v269_v39 = vmul.f32 %v519_v36, %v268_v37  ;;  %v266_v40 = vsel %vm265_vm4, %v517_v30, %v262_v38 }
 0x150   : > { %v277_v41 = vmul.f32 %v266_v40, %v243_v13 }
 0x151   : > { %v270_v42 = vmul.f32 0.5, %v269_v39 }
 0x152   : > { %439 = vmatmul.msk.f32.vlgmr.msra.gmra.mxu0 %vm227_vm0, %v277_v41 }
 0x153   : > { %v271_v43 = vsub.f32 1.5, %v270_v42 }
 0x155   : > { %v272_v44 = vmul.f32 %v519_v36, %v271_v43 }
 0x157   : > { %v276_v45 = vsel %vm275_vm7, %v519_v36, %v272_v44 }
 0x158   : > { %v278_v46 = vmul.f32 %v276_v45, %v244_v18 }
 0x15a   : > { %440 = vmatmul.msk.f32.vlgmr.msra.gmra.mxu1 %vm227_vm0, %v278_v46 }
 0x1cf   : > { %v310_v48 = vpop.f32.mrf.mxu0 }
 0x1d0   : > { %v311_v49 = vadd.f32 %v513_v47, %v310_v48 }
 0x1d2   : > { %316 = vst.msk [vmem:[%s214_s10] sm:$0xff] %vm227_vm0, %v311_v49 }
 0x1d6   : > { %325 = sbr.rel (!%p754_p11) target bundleno = 506 (0x1fa), region = 44 }
 0x1d7   : > { %v313_v50 = vpop.f32.mrf.mxu1 }
 0x1d8   : > { %v314_v51 = vadd.f32 %v513_v47, %v313_v50 }
 0x1da   : > { %317 = vst.msk [vmem:[%s214_s10 + $0x8] sm:$0xff] %vm227_vm0, %v314_v51 }
 0x1db   : > { %s939_s5 = smov (!%p328_p6, %s327_s5), 2 }
 0x1dc   : > { %s443_s6 = sshll.u32 %s939_s5, 3 }
 0x1dd   : > { %s331_s7 = ssub.s32 16, %s443_s6 }
 0x1de   : > { %s332_s30 = sshll.u32 %s331_s7, 4 }
 0x1df   : > { %333 = vsyncadd %s319_s20, %s332_s30  ;;  %p862_p13 = scmp.ne.s32.totalorder %s443_s6, 0  ;;  %s451_s24 = sshll.u32 %s723_s16, 4 }
 0x1e0   : > { %s336_s8 = scalar_lea.hbm %s918_s3, %s451_s24  ;;  %s338_s11 = sshll.u32 %s214_s10, 4  ;;  %s870_s11 = int_to_ptr.vmem [resolvable:$true] %s338_s11 }
 0x1e1   : > { %s340_s27 = sshll.u32 %s336_s8, 4  ;;  %s447_s28 = sshll.u32 %s939_s5, 7  ;;  %s872_s27 = int_to_ptr.hbm [resolvable:$true] %s340_s27 }
 0x1e2   : > { %s589_s29 = sshra.s32 %s870_s11, 4  ;;  %s591_s23 = sshrl.u32 %s447_s28, 4  ;;  %s590_s29 = int_to_ptr.vmem [resolvable:$true] %s589_s29 }
 0x1e3   : > { %s596_s26 = scalar_lea.vmem %s590_s29, %s591_s23  ;;  %s679_s16 = smov [#allocation7]  }
 0x1e4   : > { %p597_p11 = scmp.ne.s32.totalorder %s590_s29, %s596_s26  ;;  %s600_s22 = scalar_lea.vmem %s679_s16, 32 }
 0x1e5   : > { %p602_p9 = scmp.lt.s32.totalorder %s600_s22, %s596_s26 }
 0x1e6   : > { %p598_p2 = pnand %p597_p11, %p862_p13 }
 0x1e8   : > { %p599_p5 = pneg %p598_p2 }
 0x1ea   : > { %p604_p10 = pnand %p602_p9, %p599_p5 }
 0x1ec   : > { %607 = shalt.err (!%p604_p10)
}
 0x1ed   : > { %s608_s10 = sshra.s32 %s872_s27, 4  ;;  %s619_s24 = scalar_lea.hbm %s918_s3, 24  ;;  %s609_s10 = int_to_ptr.hbm [resolvable:$true] %s608_s10 }
 0x1ee   : > { %s615_s6 = scalar_lea.hbm %s609_s10, %s591_s23  ;;  %p620_p7 = scmp.lt.s32.totalorder %s609_s10, %s918_s3 }
 0x1ef   : > { %p616_p1 = scmp.ne.s32.totalorder %s609_s10, %s615_s6  ;;  %p621_p8 = scmp.lt.s32.totalorder %s619_s24, %s615_s6 }
 0x1f1   : > { %p617_p0 = pnand %p616_p1, %p862_p13  ;;  %p622_p4 = por %p621_p8, %p620_p7 }
 0x1f3   : > { %p618_p3 = pneg %p617_p0 }
 0x1f5   : > { %p623_p12 = pnand %p622_p4, %p618_p3 }
 0x1f7   : > { %626 = shalt.err (!%p623_p12)
}
 0x1f8   : > { %s680_s8 = smov 128   ;;  %s681_s29 = smov 8  }
 0x1f9   : > { %346 = dma.vmem_to_hbm [thread:$0]  (%p862_p13), %s870_s11, %s447_s28, %s872_s27, %s319_s20, %s680_s8, %s680_s8, %s681_s29  }
 0x1fa PF: > { %s355_s23 = sand.u32 1, %s658_s12   ;;  %p930_p6 = scmp.ne.s32.totalorder %s924_s25, 0 }
 0x1fb   : > { %p931_p11 = scmp.ge.s32.totalorder %s670_s15, 2  ;;  %s356_s26 = scalar_lea.sflag [#allocation4], %s355_s23 }
 0x1fd   : > { %p467_p2 = pnand %p931_p11, %p930_p6 }
 0x1ff   : > { %p468_p5 = pneg %p467_p2 }
 0x201   : > { %653 = dma.done.wait (%p468_p5), %s356_s26, 256  }
 0x202   : > { %655 = vsyncadd (%p468_p5), %s356_s26, 4294967040  ;;  %p17_p9 = scmp.ge.s32.totalorder %s727_s18, 4   ;;  %s932_s12 = smov %s662_s13 }
 0x203   : > { %s933_s13 = smov %s666_s14  ;;  %s934_s14 = smov %s739_s21 }
 0x204   : > { %s935_s15 = smov %s727_s18  ;;  %19 = sbr.rel (!%p17_p9) target bundleno = 6 (0x6), region = 81 }
 0x209   :  { %362 = vsyncpa [#allocation3], 1 }
 0x20a   :  { %364 = vsyncpa [#allocation3 + $0x1], 1 }
 0x20b   :  { %365 = vsyncpa [#allocation6], 1 }
 0x20c   :  { %366 = vsyncpa [#allocation4], 1 }
 0x20d   :  { %368 = vsyncpa [#allocation4 + $0x1], 1 }

</bundles_post_ra>
